<compile_context>
chip_gen: v6e
topology: v6e:2x2x1
jax: 0.10.0
libtpu: 0.0.40
codegen_flags: <defaults>
</compile_context>

<pallas_src>
import functools

import jax
import jax.numpy as jnp
from jax.experimental import pallas as pl
from jax.experimental.pallas import tpu as pltpu


def _pair(v):
    return (v, v) if isinstance(v, int) else (int(v[0]), int(v[1]))


def _cdiv(a, b):
    return -(-a // b)


# --------------------------------------------------------------------------
# Fast path: kw == 1, no padding  ->  1-D pooling along H, lane axis = NC*W.
# --------------------------------------------------------------------------
def _pool_h_kernel(x_ref, o_ref, *, kh, dh, sh, h_out, inv_n):
    # x_ref: (H, L) lane-dense columns; o_ref: (h_out, L)
    def tap(a):
        start = a * dh
        sl = pl.ds(start, h_out) if sh == 1 else pl.ds(start, h_out, sh)
        return x_ref[sl, :].astype(jnp.float32)

    acc = tap(0)
    for a in range(1, kh):
        acc = acc + tap(a)
    o_ref[...] = (acc * inv_n).astype(o_ref.dtype)


def _avg_pool_fast(x, kh, dh, sh, h_out, inv_n, block_bytes):
    N, C, H, W = x.shape
    NC = N * C
    NCW = NC * W
    # Lane-dense view (H, NC*W): one XLA transpose in the wrapper buys
    # unmasked stores + lane-contiguous DMAs inside the kernel.
    xt = x.reshape(NC, H, W).transpose(1, 0, 2).reshape(H, NCW)

    itemsize = x.dtype.itemsize
    col_bytes = max(1, H * itemsize)
    l_budget = max(128, (block_bytes // col_bytes) // 128 * 128)
    if NCW <= l_budget:
        L = NCW                      # single full-extent lane block
    else:
        L = l_budget
        # prefer >= 8 grid steps (v7x: 2 TCs x >= 4) if blocks stay >= 256 KiB
        l_steps = _cdiv(_cdiv(NCW, 8), 128) * 128
        if l_steps * col_bytes >= (256 << 10):
            L = max(128, min(L, l_steps))
    grid = _cdiv(NCW, L)

    cost = pl.CostEstimate(
        flops=int(NCW * h_out * (kh + 1)),
        transcendentals=0,
        bytes_accessed=int(NCW * (H + h_out) * itemsize))

    out2d = pl.pallas_call(
        functools.partial(_pool_h_kernel, kh=kh, dh=dh, sh=sh,
                          h_out=h_out, inv_n=inv_n),
        out_shape=jax.ShapeDtypeStruct((h_out, NCW), x.dtype),
        grid=(grid,),
        in_specs=[pl.BlockSpec((H, L), lambda i: (0, i))],
        out_specs=pl.BlockSpec((h_out, L), lambda i: (0, i)),
        compiler_params=pltpu.CompilerParams(
            dimension_semantics=("parallel",),
            vmem_limit_bytes=32 * 1024 * 1024),
        cost_estimate=cost,
    )(xt)

    return out2d.reshape(h_out, NC, W).transpose(1, 0, 2).reshape(
        N, C, h_out, W)


# --------------------------------------------------------------------------
# General path: kw > 1 and/or padding and/or strided W.
# --------------------------------------------------------------------------
def _pool_general_kernel(x_ref, o_ref, *scratch, kh, kw, dh, dw, sh,
                         H, W, ph, pw, h_out, wf, inv_n,
                         h_scratch, w_scratch):
    idx = 0
    rows_ref = None
    acc_ref = None
    if h_scratch:
        rows_ref = scratch[idx]
        idx += 1
    if w_scratch:
        acc_ref = scratch[idx]
        idx += 1

    Bp = x_ref.shape[0]

    # ---- H direction: window sum over rows, output row stride fused. ------
    full_h, partial_h = [], []
    for a in range(kh):
        off = a * dh - ph
        j_lo = max(0, -(off // sh))                    # ceil(-off / sh)
        j_hi = min(h_out, (H - 1 - off) // sh + 1)
        if j_hi <= j_lo:
            continue                                    # tap entirely in padding
        n = j_hi - j_lo
        start = off + j_lo * sh
        sl = pl.ds(start, n) if sh == 1 else pl.ds(start, n, sh)
        if j_lo == 0 and j_hi == h_out:
            full_h.append(sl)
        else:
            partial_h.append((j_lo, j_hi, sl))

    def read_h(sl):
        return x_ref[:, sl, :].astype(jnp.float32)

    if full_h:
        rows_val = read_h(full_h[0])
        for sl in full_h[1:]:
            rows_val = rows_val + read_h(sl)            # register accumulation
    else:
        rows_val = jnp.zeros((Bp, h_out, W), jnp.float32)

    if partial_h:                                       # boundary taps only
        rows_ref[...] = rows_val
        for (j_lo, j_hi, sl) in partial_h:
            rows_ref[:, j_lo:j_hi, :] += read_h(sl)
        rows_val = rows_ref[...]

    # ---- W direction: window sum over stride-1 columns. -------------------
    full_w, partial_w = [], []
    for b in range(kw):
        offw = b * dw - pw
        c_lo = max(0, -offw)
        c_hi = min(wf, W - offw)
        if c_hi <= c_lo:
            continue
        if c_lo == 0 and c_hi == wf:
            full_w.append(offw)
        else:
            partial_w.append((c_lo, c_hi, offw))

    def col_term(c_lo, c_hi, offw):
        return rows_val[:, :, c_lo + offw:c_hi + offw]

    if full_w:
        acc_val = col_term(0, wf, full_w[0])
        for offw in full_w[1:]:
            acc_val = acc_val + col_term(0, wf, offw)   # register accumulation
    else:
        acc_val = jnp.zeros((Bp, h_out, wf), jnp.float32)

    if partial_w:                                       # boundary taps only
        acc_ref[...] = acc_val
        for (c_lo, c_hi, offw) in partial_w:
            acc_ref[:, :, c_lo:c_hi] += col_term(c_lo, c_hi, offw)
        acc_val = acc_ref[...]

    o_ref[...] = (acc_val * inv_n).astype(o_ref.dtype)


def _avg_pool_general(x, kh, kw, dh, dw, sh, sw, ph, pw, h_out, wf, inv_n,
                      block_bytes):
    N, C, H, W = x.shape
    NC = N * C
    xp = x.reshape(NC, H, W)

    itemsize = x.dtype.itemsize
    plane_bytes = max(1, H * W * itemsize)
    bp = max(1, min(NC, block_bytes // plane_bytes))
    bp_steps = _cdiv(NC, 8)
    if bp_steps * plane_bytes >= (256 << 10):           # keep >=8 steps if big
        bp = max(1, min(bp, bp_steps))
    grid = _cdiv(NC, bp)                                # partial last block OK

    h_scratch = ph > 0
    w_scratch = pw > 0
    scratch = []
    if h_scratch:
        scratch.append(pltpu.VMEM((bp, h_out, W), jnp.float32))
    if w_scratch:
        scratch.append(pltpu.VMEM((bp, h_out, wf), jnp.float32))

    kernel = functools.partial(
        _pool_general_kernel, kh=kh, kw=kw, dh=dh, dw=dw, sh=sh,
        H=H, W=W, ph=ph, pw=pw, h_out=h_out, wf=wf, inv_n=inv_n,
        h_scratch=h_scratch, w_scratch=w_scratch)

    cost = pl.CostEstimate(
        flops=int(NC * h_out * (kh * W + kw * wf + wf)),
        transcendentals=0,
        bytes_accessed=int(NC * (H * W + h_out * wf) * itemsize))

    wide = pl.pallas_call(
        kernel,
        out_shape=jax.ShapeDtypeStruct((NC, h_out, wf), x.dtype),
        grid=(grid,),
        in_specs=[pl.BlockSpec((bp, H, W), lambda i: (i, 0, 0))],
        out_specs=pl.BlockSpec((bp, h_out, wf), lambda i: (i, 0, 0)),
        scratch_shapes=scratch,
        compiler_params=pltpu.CompilerParams(
            dimension_semantics=("parallel",),
            vmem_limit_bytes=32 * 1024 * 1024),
        cost_estimate=cost,
    )(xp)

    # TODO(synk): in-kernel lane-strided W downsample; left to XLA for sw > 1.
    out = wide if sw == 1 else wide[:, :, ::sw]
    w_out = (wf - 1) // sw + 1
    return out.reshape(N, C, h_out, w_out)


def avg_pool2d_with_conv(x, kernel_size, stride, dilation=1, padding=0,
                         block_bytes=4 << 20):
    """Equivalent of AvgPool2dWithConv.forward for NCHW input x."""
    kh, kw = _pair(kernel_size)
    sh, sw = _pair(stride)
    dh, dw = _pair(dilation)
    ph, pw = _pair(padding)

    N, C, H, W = x.shape
    Hp, Wp = H + 2 * ph, W + 2 * pw
    hf = Hp - dh * (kh - 1)              # stride-1 output extents
    wf = Wp - dw * (kw - 1)
    assert hf >= 1 and wf >= 1, "pooling window larger than padded input"
    h_out = (hf - 1) // sh + 1
    inv_n = 1.0 / float(kh * kw)         # deterministic pooling weights folded

    fast = (kw == 1 and ph == 0 and pw == 0 and (sw == 1 or W == 1))
    if fast:
        return _avg_pool_fast(x, kh, dh, sh, h_out, inv_n, block_bytes)
    return _avg_pool_general(x, kh, kw, dh, dw, sh, sw, ph, pw,
                             h_out, wf, inv_n, block_bytes)


def _reference(x, kernel_size, stride, dilation, padding):
    kh, kw = _pair(kernel_size)
    sh, sw = _pair(stride)
    dh, dw = _pair(dilation)
    ph, pw = _pair(padding)
    C = x.shape[1]
    w = jnp.ones((C, 1, kh, kw), x.dtype) / float(kh * kw)
    return jax.lax.conv_general_dilated(
        x, w, window_strides=(sh, sw), padding=[(ph, ph), (pw, pw)],
        rhs_dilation=(dh, dw), dimension_numbers=("NCHW", "OIHW", "NCHW"),
        feature_group_count=C)


if __name__ == "__main__":
    key = jax.random.PRNGKey(0)
    k1, k2, k3 = jax.random.split(key, 3)

    # Case 1: general path — dilated 3x3 window, stride 2, padding 2
    # (exercises valid-subrange padding handling and the wrapper W slice).
    x1 = jax.random.normal(k1, (2, 4, 16, 16), dtype=jnp.float32)
    cfg1 = dict(kernel_size=(3, 3), stride=(2, 2), dilation=(2, 2), padding=(2, 2))
    out1 = jax.block_until_ready(avg_pool2d_with_conv(x1, **cfg1))
    ref1 = _reference(x1, **cfg1)
    assert out1.shape == ref1.shape, (out1.shape, ref1.shape)
    assert jnp.allclose(out1, ref1, atol=1e-5, rtol=1e-5)

    # Case 2: fast path — pooling over time only, kernel (4,1), stride (3,1),
    # no padding (lane-dense layout, fused H stride, single store).
    x2 = jax.random.normal(k2, (2, 4, 24, 8), dtype=jnp.float32)
    cfg2 = dict(kernel_size=(4, 1), stride=(3, 1), dilation=(1, 1), padding=(0, 0))
    out2 = jax.block_until_ready(avg_pool2d_with_conv(x2, **cfg2))
    ref2 = _reference(x2, **cfg2)
    assert out2.shape == ref2.shape, (out2.shape, ref2.shape)
    assert jnp.allclose(out2, ref2, atol=1e-5, rtol=1e-5)

    # Case 3: fast path with W == 1 (typical braindecode Deep4 shape).
    x3 = jax.random.normal(k3, (2, 4, 32, 1), dtype=jnp.float32)
    cfg3 = dict(kernel_size=(3, 1), stride=(3, 1), dilation=(1, 1), padding=(0, 0))
    out3 = jax.block_until_ready(avg_pool2d_with_conv(x3, **cfg3))
    ref3 = _reference(x3, **cfg3)
    assert out3.shape == ref3.shape, (out3.shape, ref3.shape)
    assert jnp.allclose(out3, ref3, atol=1e-5, rtol=1e-5)

    print("KERNEL_OK")
</pallas_src>

<mosaic_0001>
module attributes {stable_mosaic.version = 11 : i64} {
  func.func @_pool_general_kernel(%arg0: i32, %arg1: memref<8x16x16xf32, #tpu.memory_space<vmem>>, %arg2: memref<8x8x16xf32, #tpu.memory_space<vmem>>, %arg3: memref<8x8x16xf32, #tpu.memory_space<vmem>>, %arg4: memref<8x8x16xf32, #tpu.memory_space<vmem>>) attributes {dimension_semantics = [#tpu.dimension_semantics<parallel>], iteration_bounds = array<i64: 1>, scalar_prefetch = 0 : i64, scratch_operands = 2 : i64, tpu.core_type = #tpu.core_type<tc>, window_params = [{transform_indices = @transform_0, window_bounds = array<i64: 8, 16, 16>}, {transform_indices = @transform_1, window_bounds = array<i64: 8, 8, 16>}]} {
    %c0 = arith.constant 0 : index
    %c0_0 = arith.constant 0 : index
    %c0_1 = arith.constant 0 : index
    %0 = tpu.strided_load %arg1[%c0, %c0_0, %c0_1] {strides = array<i32: 1, 2, 1>} : memref<8x16x16xf32, #tpu.memory_space<vmem>>, vector<8x8x16xf32>
    %c0_2 = arith.constant 0 : index
    %c0_3 = arith.constant 0 : index
    %c0_4 = arith.constant 0 : index
    %1 = vector.load %arg3[%c0_2, %c0_3, %c0_4] : memref<8x8x16xf32, #tpu.memory_space<vmem>>, vector<8x8x16xf32>
    tpu.vector_store %arg3[%c0_2, %c0_3, %c0_4], %0 {strides = array<i32>} : memref<8x8x16xf32, #tpu.memory_space<vmem>>, vector<8x8x16xf32>,
    %c0_5 = arith.constant 0 : index
    %c1 = arith.constant 1 : index
    %c0_6 = arith.constant 0 : index
    %2 = vector.load %arg3[%c0_5, %c1, %c0_6] : memref<8x8x16xf32, #tpu.memory_space<vmem>>, vector<8x7x16xf32>
    %c0_7 = arith.constant 0 : index
    %c0_8 = arith.constant 0 : index
    %c0_9 = arith.constant 0 : index
    %3 = tpu.strided_load %arg1[%c0_7, %c0_8, %c0_9] {strides = array<i32: 1, 2, 1>} : memref<8x16x16xf32, #tpu.memory_space<vmem>>, vector<8x7x16xf32>
    %4 = arith.addf %2, %3 : vector<8x7x16xf32>
    %c0_10 = arith.constant 0 : index
    %c1_11 = arith.constant 1 : index
    %c0_12 = arith.constant 0 : index
    %5 = vector.load %arg3[%c0_10, %c1_11, %c0_12] : memref<8x8x16xf32, #tpu.memory_space<vmem>>, vector<8x7x16xf32>
    tpu.vector_store %arg3[%c0_10, %c1_11, %c0_12], %4 {strides = array<i32>} : memref<8x8x16xf32, #tpu.memory_space<vmem>>, vector<8x7x16xf32>,
    %c0_13 = arith.constant 0 : index
    %c0_14 = arith.constant 0 : index
    %c0_15 = arith.constant 0 : index
    %6 = vector.load %arg3[%c0_13, %c0_14, %c0_15] : memref<8x8x16xf32, #tpu.memory_space<vmem>>, vector<8x7x16xf32>
    %c0_16 = arith.constant 0 : index
    %c2 = arith.constant 2 : index
    %c0_17 = arith.constant 0 : index
    %7 = tpu.strided_load %arg1[%c0_16, %c2, %c0_17] {strides = array<i32: 1, 2, 1>} : memref<8x16x16xf32, #tpu.memory_space<vmem>>, vector<8x7x16xf32>
    %8 = arith.addf %6, %7 : vector<8x7x16xf32>
    %c0_18 = arith.constant 0 : index
    %c0_19 = arith.constant 0 : index
    %c0_20 = arith.constant 0 : index
    %9 = vector.load %arg3[%c0_18, %c0_19, %c0_20] : memref<8x8x16xf32, #tpu.memory_space<vmem>>, vector<8x7x16xf32>
    tpu.vector_store %arg3[%c0_18, %c0_19, %c0_20], %8 {strides = array<i32>} : memref<8x8x16xf32, #tpu.memory_space<vmem>>, vector<8x7x16xf32>,
    %c0_21 = arith.constant 0 : index
    %c0_22 = arith.constant 0 : index
    %c0_23 = arith.constant 0 : index
    %10 = vector.load %arg3[%c0_21, %c0_22, %c0_23] : memref<8x8x16xf32, #tpu.memory_space<vmem>>, vector<8x8x16xf32>
    %c0_24 = arith.constant 0 : index
    %c0_25 = arith.constant 0 : index
    %c0_26 = arith.constant 0 : index
    %11 = vector.load %arg4[%c0_24, %c0_25, %c0_26] : memref<8x8x16xf32, #tpu.memory_space<vmem>>, vector<8x8x16xf32>
    tpu.vector_store %arg4[%c0_24, %c0_25, %c0_26], %10 {strides = array<i32>} : memref<8x8x16xf32, #tpu.memory_space<vmem>>, vector<8x8x16xf32>,
    %c0_27 = arith.constant 0 : index
    %c0_28 = arith.constant 0 : index
    %c2_29 = arith.constant 2 : index
    %12 = vector.load %arg4[%c0_27, %c0_28, %c2_29] : memref<8x8x16xf32, #tpu.memory_space<vmem>>, vector<8x8x14xf32>
    %13 = vector.extract_strided_slice %10 {offsets = [0, 0, 0], sizes = [8, 8, 14], strides = [1, 1, 1]} : vector<8x8x16xf32> to vector<8x8x14xf32>
    %14 = arith.addf %12, %13 : vector<8x8x14xf32>
    %c0_30 = arith.constant 0 : index
    %c0_31 = arith.constant 0 : index
    %c2_32 = arith.constant 2 : index
    %15 = vector.load %arg4[%c0_30, %c0_31, %c2_32] : memref<8x8x16xf32, #tpu.memory_space<vmem>>, vector<8x8x14xf32>
    tpu.vector_store %arg4[%c0_30, %c0_31, %c2_32], %14 {strides = array<i32>} : memref<8x8x16xf32, #tpu.memory_space<vmem>>, vector<8x8x14xf32>,
    %c0_33 = arith.constant 0 : index
    %c0_34 = arith.constant 0 : index
    %c0_35 = arith.constant 0 : index
    %16 = vector.load %arg4[%c0_33, %c0_34, %c0_35] : memref<8x8x16xf32, #tpu.memory_space<vmem>>, vector<8x8x14xf32>
    %17 = vector.extract_strided_slice %10 {offsets = [0, 0, 2], sizes = [8, 8, 14], strides = [1, 1, 1]} : vector<8x8x16xf32> to vector<8x8x14xf32>
    %18 = arith.addf %16, %17 : vector<8x8x14xf32>
    %c0_36 = arith.constant 0 : index
    %c0_37 = arith.constant 0 : index
    %c0_38 = arith.constant 0 : index
    %19 = vector.load %arg4[%c0_36, %c0_37, %c0_38] : memref<8x8x16xf32, #tpu.memory_space<vmem>>, vector<8x8x14xf32>
    tpu.vector_store %arg4[%c0_36, %c0_37, %c0_38], %18 {strides = array<i32>} : memref<8x8x16xf32, #tpu.memory_space<vmem>>, vector<8x8x14xf32>,
    %c0_39 = arith.constant 0 : index
    %c0_40 = arith.constant 0 : index
    %c0_41 = arith.constant 0 : index
    %20 = vector.load %arg4[%c0_39, %c0_40, %c0_41] : memref<8x8x16xf32, #tpu.memory_space<vmem>>, vector<8x8x16xf32>
    %cst = arith.constant 0.111111112 : f32
    %21 = vector.broadcast %cst : f32 to vector<8x8x16xf32>
    %22 = arith.mulf %20, %21 : vector<8x8x16xf32>
    %c0_42 = arith.constant 0 : index
    %c0_43 = arith.constant 0 : index
    %c0_44 = arith.constant 0 : index
    %23 = vector.load %arg2[%c0_42, %c0_43, %c0_44] : memref<8x8x16xf32, #tpu.memory_space<vmem>>, vector<8x8x16xf32>
    tpu.vector_store %arg2[%c0_42, %c0_43, %c0_44], %22 {strides = array<i32>} : memref<8x8x16xf32, #tpu.memory_space<vmem>>, vector<8x8x16xf32>,
    return
  }
  func.func @transform_0(%arg0: i32) -> (i32, i32, i32) {
    %c0_i32 = arith.constant 0 : i32
    %c0_i32_0 = arith.constant 0 : i32
    %c0_i32_1 = arith.constant 0 : i32
    return %arg0, %c0_i32, %c0_i32_0 : i32, i32, i32
  }
  func.func @transform_1(%arg0: i32) -> (i32, i32, i32) {
    %c0_i32 = arith.constant 0 : i32
    %c0_i32_0 = arith.constant 0 : i32
    %c0_i32_1 = arith.constant 0 : i32
    return %arg0, %c0_i32, %c0_i32_0 : i32, i32, i32
  }
}

</mosaic_0001>

<bundles_post_ra>
// kernel: tpu_custom_call.1
= control target key start
LH: loop header
LB: loop body
LE: loop exit
PB: predicated region body
PF: predicated region fallthrough
CT: control target
= control target key end

     0   :  { %6 = vsyncpa [#allocation5], 0  ;;  %s417_s0 = inlined_call_operand.hbm [shape: f32[8,16,16], index: 0, kind: input, shape index: {}]   ;;  %s418_s1 = inlined_call_operand.hbm [shape: f32[8,8,16], index: 1, kind: output, shape index: {}]  }
   0x1   :  { %7 = vsyncpa [#allocation6], 0  ;;  %s333_s6 = smov [#allocation4]  }
   0x2   :  { %s13_s7 = sshll.u32 %s333_s6, 4  ;;  %s14_s7 = int_to_ptr.vmem [resolvable:$true] %s13_s7 }
   0x3   :  { %s297_s8 = scalar_lea.vmem %s14_s7, 2048  ;;  %p302_p1 = scmp.lt.s32.totalorder %s14_s7, %s14_s7 }
   0x4   :  { %p298_p0 = scmp.ne.s32.totalorder %s14_s7, %s297_s8  ;;  %p303_p2 = scmp.lt.s32.totalorder %s297_s8, %s297_s8 }
   0x6   :  { %p304_p3 = por %p303_p2, %p302_p1 }
   0x8   :  { %p305_p4 = pnand %p304_p3, %p298_p0 }
   0xa   :  { %308 = shalt.err (!%p305_p4)
}
   0xb   :  { %s334_s9 = smov 128   ;;  %s335_s10 = smov 8  }
   0xc   :  { %19 = dma.hbm_to_vmem [thread:$0]  %s417_s0, 2048, %s14_s7, [#allocation5], %s334_s9, %s334_s9, %s335_s10  }
   0xd   :  { %329 = dma.done.wait [#allocation5], 2048  }
   0xe   :  { %330 = vsyncadd [#allocation5], 4294965248  ;;  %vm38_vm0 = vcmask 130048   ;;  %v27_v0 = vld [vmem:[#allocation4 + $0x20] ss:$2 sm:$0xff]  ;;  %vm71_vm1 = vcmask 129024  }
   0xf   :  { %41 = vst.msk [vmem:[#allocation2 + $0x10] sm:$0xff] %vm38_vm0, %v27_v0  ;;  %v23_v1 = vld [vmem:[#allocation4] ss:$2 sm:$0xff]  ;;  %v29_v2 = vld [vmem:[#allocation4 + $0x30] ss:$2 sm:$0xff]  ;;  %s336_s0 = smov 2  }
  0x10   :  { %39 = vst.msk [vmem:[#allocation2] sm:$0xff] %vm38_vm0, %v23_v1  ;;  %42 = vst.msk [vmem:[#allocation2 + $0x18] sm:$0xff] %vm38_vm0, %v29_v2  ;;  %v25_v3 = vld [vmem:[#allocation4 + $0x10] ss:$2 sm:$0xff]  ;;  %v31_v7 = vld [vmem:[#allocation4 + $0x40] ss:$2 sm:$0xff] }
  0x11   :  { %40 = vst.msk [vmem:[#allocation2 + $0x8] sm:$0xff] %vm38_vm0, %v25_v3  ;;  %v57_v4 = vld [vmem:[#allocation4 + $0x20] ss:$2 sm:$0x7f]  ;;  %v33_v5 = vld [vmem:[#allocation4 + $0x50] ss:$2 sm:$0xff] }
  0x12   :  { %v55_v6 = vld [vmem:[#allocation4] ss:$2 sm:$0x7f]  ;;  %44 = vst.msk [vmem:[#allocation2 + $0x28] sm:$0xff] %vm38_vm0, %v33_v5  ;;  %43 = vst.msk [vmem:[#allocation2 + $0x20] sm:$0xff] %vm38_vm0, %v31_v7  ;;  %s337_s13 = smov 126  }
  0x13   :  { %v58_v11 = vld [vmem:[#allocation4 + $0x30] ss:$2 sm:$0x7f]  ;;  %v35_v19 = vld [vmem:[#allocation4 + $0x60] ss:$2 sm:$0xff]  ;;  %vm184_vm2 = vcmask 130064  }
  0x14   :  { %v56_v13 = vld [vmem:[#allocation4 + $0x10] ss:$2 sm:$0x7f]  ;;  %v59_v21 = vld [vmem:[#allocation4 + $0x40] ss:$2 sm:$0x7f] }
  0x15   :  { %v37_v14 = vld [vmem:[#allocation4 + $0x70] ss:$2 sm:$0xff]  ;;  %45 = vst.msk [vmem:[#allocation2 + $0x30] sm:$0xff] %vm38_vm0, %v35_v19  ;;  %v93_v25 = vld [vmem:[#allocation4 + $0x22] ss:$2 sm:$0x7f] }
  0x16   :  { %v49_v8 = vld [vmem:[#allocation2 + $0x11] sm:$0x7f]  ;;  %46 = vst.msk [vmem:[#allocation2 + $0x38] sm:$0xff] %vm38_vm0, %v37_v14  ;;  %v89_v28 = vld [vmem:[#allocation4 + $0x2] ss:$2 sm:$0x7f] }
  0x17   :  { %v65_v9 = vadd.f32 %v57_v4, %v49_v8  ;;  %v47_v10 = vld [vmem:[#allocation2 + $0x1] sm:$0x7f]  ;;  %v50_v15 = vld [vmem:[#allocation2 + $0x19] sm:$0x7f]  ;;  %vm233_vm3 = vcmask 113664   ;;  %s338_s14 = smov [#allocation7]  }
  0x18   :  { %v63_v12 = vadd.f32 %v55_v6, %v47_v10  ;;  %v60_v16 = vld [vmem:[#allocation4 + $0x50] ss:$2 sm:$0x7f]  ;;  %v66_v17 = vadd.f32 %v58_v11, %v50_v15  ;;  %v48_v18 = vld [vmem:[#allocation2 + $0x9] sm:$0x7f]  ;;  %s271_s15 = sshll.u32 %s338_s14, 4  ;;  %s272_s15 = int_to_ptr.vmem [resolvable:$true] %s271_s15 }
  0x19   :  { %74 = vst.msk [vmem:[#allocation2 + $0x11] sm:$0x7f] %vm71_vm1, %v65_v9  ;;  %v64_v20 = vadd.f32 %v56_v13, %v48_v18  ;;  %v52_v22 = vld [vmem:[#allocation2 + $0x29] sm:$0x7f]  ;;  %v51_v24 = vld [vmem:[#allocation2 + $0x21] sm:$0x7f]  ;;  %p314_p6 = scmp.lt.s32.totalorder %s272_s15, %s272_s15 }
  0x1a   :  { %72 = vst.msk [vmem:[#allocation2 + $0x1] sm:$0x7f] %vm71_vm1, %v63_v12  ;;  %75 = vst.msk [vmem:[#allocation2 + $0x19] sm:$0x7f] %vm71_vm1, %v66_v17  ;;  %v68_v23 = vadd.f32 %v60_v16, %v52_v22  ;;  %v67_v26 = vadd.f32 %v59_v21, %v51_v24  ;;  %s309_s16 = scalar_lea.vmem %s272_s15, 1024 }
  0x1b   :  { %73 = vst.msk [vmem:[#allocation2 + $0x9] sm:$0x7f] %vm71_vm1, %v64_v20  ;;  %v62_v27 = vld [vmem:[#allocation4 + $0x70] ss:$2 sm:$0x7f]  ;;  %p310_p5 = scmp.ne.s32.totalorder %s272_s15, %s309_s16  ;;  %p315_p7 = scmp.lt.s32.totalorder %s309_s16, %s309_s16 }
  0x1c   :  { %77 = vst.msk [vmem:[#allocation2 + $0x29] sm:$0x7f] %vm71_vm1, %v68_v23  ;;  %v61_v29 = vld [vmem:[#allocation4 + $0x60] ss:$2 sm:$0x7f] }
  0x1d   :  { %76 = vst.msk [vmem:[#allocation2 + $0x21] sm:$0x7f] %vm71_vm1, %v67_v26  ;;  %v54_v31 = vld [vmem:[#allocation2 + $0x39] sm:$0x7f]  ;;  %v53_v38 = vld [vmem:[#allocation2 + $0x31] sm:$0x7f]  ;;  %p316_p8 = por %p315_p7, %p314_p6 }
  0x1e   :  { %v95_v34 = vld [vmem:[#allocation4 + $0x32] ss:$2 sm:$0x7f]  ;;  %v70_v35 = vadd.f32 %v62_v27, %v54_v31  ;;  %v69_v40 = vadd.f32 %v61_v29, %v53_v38  ;;  %v97_v45 = vld [vmem:[#allocation4 + $0x42] ss:$2 sm:$0x7f] }
  0x1f   :  { %v91_v37 = vld [vmem:[#allocation4 + $0x12] ss:$2 sm:$0x7f]  ;;  %v101_v53 = vld [vmem:[#allocation4 + $0x62] ss:$2 sm:$0x7f]  ;;  %p317_p9 = pnand %p316_p8, %p310_p5 }
  0x20   :  { %v82_v30 = vld [vmem:[#allocation2 + $0x10] sm:$0x7f]  ;;  %79 = vst.msk [vmem:[#allocation2 + $0x39] sm:$0x7f] %vm71_vm1, %v70_v35  ;;  %78 = vst.msk [vmem:[#allocation2 + $0x31] sm:$0x7f] %vm71_vm1, %v69_v40 }
  0x21   :  { %v106_v32 = vadd.f32 %v93_v25, %v82_v30  ;;  %v80_v33 = vld [vmem:[#allocation2] sm:$0x7f]  ;;  %v83_v39 = vld [vmem:[#allocation2 + $0x18] sm:$0x7f] }
  0x22   :  { %v104_v36 = vadd.f32 %v89_v28, %v80_v33  ;;  %v107_v41 = vadd.f32 %v95_v34, %v83_v39  ;;  %v81_v42 = vld [vmem:[#allocation2 + $0x8] sm:$0x7f]  ;;  %v99_v43 = vld [vmem:[#allocation4 + $0x52] ss:$2 sm:$0x7f] }
  0x23   :  { %114 = vst.msk [vmem:[#allocation2 + $0x10] sm:$0x7f] %vm71_vm1, %v106_v32  ;;  %v105_v44 = vadd.f32 %v91_v37, %v81_v42  ;;  %v85_v46 = vld [vmem:[#allocation2 + $0x28] sm:$0x7f] }
  0x24   :  { %112 = vst.msk [vmem:[#allocation2] sm:$0x7f] %vm71_vm1, %v104_v36  ;;  %115 = vst.msk [vmem:[#allocation2 + $0x18] sm:$0x7f] %vm71_vm1, %v107_v41  ;;  %v109_v47 = vadd.f32 %v99_v43, %v85_v46  ;;  %v84_v48 = vld [vmem:[#allocation2 + $0x20] sm:$0x7f] }
  0x25   :  { %113 = vst.msk [vmem:[#allocation2 + $0x8] sm:$0x7f] %vm71_vm1, %v105_v44  ;;  %v108_v49 = vadd.f32 %v97_v45, %v84_v48  ;;  %v103_v50 = vld [vmem:[#allocation4 + $0x72] ss:$2 sm:$0x7f] }
  0x26   :  { %117 = vst.msk [vmem:[#allocation2 + $0x28] sm:$0x7f] %vm71_vm1, %v109_v47 }
  0x27   :  { %116 = vst.msk [vmem:[#allocation2 + $0x20] sm:$0x7f] %vm71_vm1, %v108_v49  ;;  %v87_v52 = vld [vmem:[#allocation2 + $0x38] sm:$0x7f]  ;;  %v86_v56 = vld [vmem:[#allocation2 + $0x30] sm:$0x7f] }
  0x28   :  { %v111_v55 = vadd.f32 %v103_v50, %v87_v52  ;;  %v110_v58 = vadd.f32 %v101_v53, %v86_v56 }
  0x2a   :  { %v122_v51 = vld [vmem:[#allocation2 + $0x10] sm:$0xff]  ;;  %119 = vst.msk [vmem:[#allocation2 + $0x38] sm:$0x7f] %vm71_vm1, %v111_v55  ;;  %118 = vst.msk [vmem:[#allocation2 + $0x30] sm:$0x7f] %vm71_vm1, %v110_v58 }
  0x2b   :  { %156 = vrot.lane.b32.xlu1 %v122_v51, %s336_s0  ;;  %130 = vst.msk [vmem:[#allocation3 + $0x10] sm:$0xff] %vm38_vm0, %v122_v51  ;;  %v120_v54 = vld [vmem:[#allocation2] sm:$0xff]  ;;  %v123_v57 = vld [vmem:[#allocation2 + $0x18] sm:$0xff] }
  0x2c   :  { %152 = vrot.lane.b32.xlu0 %v120_v54, %s336_s0  ;;  %128 = vst.msk [vmem:[#allocation3] sm:$0xff] %vm38_vm0, %v120_v54  ;;  %131 = vst.msk [vmem:[#allocation3 + $0x18] sm:$0xff] %vm38_vm0, %v123_v57  ;;  %v121_v59 = vld [vmem:[#allocation2 + $0x8] sm:$0xff] }
  0x2d   :  { %129 = vst.msk [vmem:[#allocation3 + $0x8] sm:$0xff] %vm38_vm0, %v121_v59  ;;  %v125_v60 = vld [vmem:[#allocation2 + $0x28] sm:$0xff] }
  0x2e   :  { %133 = vst.msk [vmem:[#allocation3 + $0x28] sm:$0xff] %vm38_vm0, %v125_v60  ;;  %v124_v61 = vld [vmem:[#allocation2 + $0x20] sm:$0xff] }
  0x2f   :  { %158 = vrot.lane.b32.xlu1 %v123_v57, %s336_s0  ;;  %132 = vst.msk [vmem:[#allocation3 + $0x20] sm:$0xff] %vm38_vm0, %v124_v61 }
  0x30   :  { %154 = vrot.lane.b32.xlu0 %v121_v59, %s336_s0 }
  0x31   :  { %v127_v62 = vld [vmem:[#allocation2 + $0x38] sm:$0xff]  ;;  %v126_v63 = vld [vmem:[#allocation2 + $0x30] sm:$0xff] }
  0x32   :  { %135 = vst.msk [vmem:[#allocation3 + $0x38] sm:$0xff] %vm38_vm0, %v127_v62  ;;  %134 = vst.msk [vmem:[#allocation3 + $0x30] sm:$0xff] %vm38_vm0, %v126_v63  ;;  %v138_v0 = vld [vmem:[#allocation3 + $0x10] sm:$0xff] }
  0x33   :  { %162 = vrot.lane.b32.xlu1 %v125_v60, %s336_s0  ;;  %v136_v1 = vld [vmem:[#allocation3] sm:$0xff]  ;;  %v139_v6 = vld [vmem:[#allocation3 + $0x18] sm:$0xff] }
  0x34   :  { %160 = vrot.lane.b32.xlu0 %v124_v61, %s336_s0  ;;  %v137_v7 = vld [vmem:[#allocation3 + $0x8] sm:$0xff] }
  0x35   :  { %v141_v12 = vld [vmem:[#allocation3 + $0x28] sm:$0xff] }
  0x36   :  { %v140_v13 = vld [vmem:[#allocation3 + $0x20] sm:$0xff] }
  0x37   :  { %166 = vrot.lane.b32.xlu1 %v127_v62, %s336_s0 }
  0x38   :  { %164 = vrot.lane.b32.xlu0 %v126_v63, %s336_s0 }
  0x39   :  { %v143_v18 = vld [vmem:[#allocation3 + $0x38] sm:$0xff]  ;;  %v142_v19 = vld [vmem:[#allocation3 + $0x30] sm:$0xff] }
  0x3b   :  { %203 = vrot.lane.b32.xlu1 %v121_v59, %s337_s13 }
  0x3c   :  { %201 = vrot.lane.b32.xlu0 %v120_v54, %s337_s13 }
  0x3f   :  { %207 = vrot.lane.b32.xlu1 %v123_v57, %s337_s13 }
  0x40   :  { %205 = vrot.lane.b32.xlu0 %v122_v51, %s337_s13 }
  0x43   :  { %211 = vrot.lane.b32.xlu1 %v125_v60, %s337_s13 }
  0x44   :  { %209 = vrot.lane.b32.xlu0 %v124_v61, %s337_s13 }
  0x47   :  { %215 = vrot.lane.b32.xlu1 %v127_v62, %s337_s13 }
  0x48   :  { %213 = vrot.lane.b32.xlu0 %v126_v63, %s337_s13 }
  0x9d   :  { %v157_v2 = vpop.permute.xlu1 %156 }
  0x9e   :  { %v178_v3 = vadd.f32 %v157_v2, %v138_v0  ;;  %v153_v4 = vpop.permute.xlu0 %152 }
  0x9f   :  { %v176_v5 = vadd.f32 %v153_v4, %v136_v1 }
  0xa0   :  { %187 = vst.msk [vmem:[#allocation3 + $0x10] sm:$0xff] %vm184_vm2, %v178_v3 }
  0xa1   :  { %185 = vst.msk [vmem:[#allocation3] sm:$0xff] %vm184_vm2, %v176_v5  ;;  %v159_v8 = vpop.permute.xlu1 %158 }
  0xa2   :  { %v179_v9 = vadd.f32 %v159_v8, %v139_v6  ;;  %v155_v10 = vpop.permute.xlu0 %154 }
  0xa3   :  { %v177_v11 = vadd.f32 %v155_v10, %v137_v7 }
  0xa4   :  { %188 = vst.msk [vmem:[#allocation3 + $0x18] sm:$0xff] %vm184_vm2, %v179_v9 }
  0xa5   :  { %186 = vst.msk [vmem:[#allocation3 + $0x8] sm:$0xff] %vm184_vm2, %v177_v11  ;;  %v163_v14 = vpop.permute.xlu1 %162 }
  0xa6   :  { %v181_v15 = vadd.f32 %v163_v14, %v141_v12  ;;  %v161_v16 = vpop.permute.xlu0 %160 }
  0xa7   :  { %v180_v17 = vadd.f32 %v161_v16, %v140_v13  ;;  %v195_v33 = vld [vmem:[#allocation3 + $0x10] sm:$0xff] }
  0xa8   :  { %190 = vst.msk [vmem:[#allocation3 + $0x28] sm:$0xff] %vm184_vm2, %v181_v15  ;;  %v193_v28 = vld [vmem:[#allocation3] sm:$0xff] }
  0xa9   :  { %189 = vst.msk [vmem:[#allocation3 + $0x20] sm:$0xff] %vm184_vm2, %v180_v17  ;;  %v167_v20 = vpop.permute.xlu1 %166 }
  0xaa   :  { %v183_v21 = vadd.f32 %v167_v20, %v143_v18  ;;  %v165_v22 = vpop.permute.xlu0 %164 }
  0xab   :  { %v182_v23 = vadd.f32 %v165_v22, %v142_v19  ;;  %v196_v30 = vld [vmem:[#allocation3 + $0x18] sm:$0xff] }
  0xac   :  { %192 = vst.msk [vmem:[#allocation3 + $0x38] sm:$0xff] %vm184_vm2, %v183_v21  ;;  %v194_v25 = vld [vmem:[#allocation3 + $0x8] sm:$0xff] }
  0xad   :  { %191 = vst.msk [vmem:[#allocation3 + $0x30] sm:$0xff] %vm184_vm2, %v182_v23  ;;  %v204_v24 = vpop.permute.xlu1 %203 }
  0xae   :  { %v226_v26 = vadd.f32 %v204_v24, %v194_v25  ;;  %v202_v27 = vpop.permute.xlu0 %201 }
  0xaf   :  { %v225_v29 = vadd.f32 %v202_v27, %v193_v28  ;;  %v198_v36 = vld [vmem:[#allocation3 + $0x28] sm:$0xff] }
  0xb0   :  { %235 = vst.msk [vmem:[#allocation3 + $0x8] sm:$0xff] %vm233_vm3, %v226_v26  ;;  %v197_v39 = vld [vmem:[#allocation3 + $0x20] sm:$0xff] }
  0xb1   :  { %234 = vst.msk [vmem:[#allocation3] sm:$0xff] %vm233_vm3, %v225_v29  ;;  %v208_v31 = vpop.permute.xlu1 %207 }
  0xb2   :  { %v228_v32 = vadd.f32 %v208_v31, %v196_v30  ;;  %v206_v34 = vpop.permute.xlu0 %205 }
  0xb3   :  { %v227_v35 = vadd.f32 %v206_v34, %v195_v33  ;;  %v200_v45 = vld [vmem:[#allocation3 + $0x38] sm:$0xff] }
  0xb4   :  { %237 = vst.msk [vmem:[#allocation3 + $0x18] sm:$0xff] %vm233_vm3, %v228_v32  ;;  %v199_v49 = vld [vmem:[#allocation3 + $0x30] sm:$0xff] }
  0xb5   :  { %236 = vst.msk [vmem:[#allocation3 + $0x10] sm:$0xff] %vm233_vm3, %v227_v35  ;;  %v212_v37 = vpop.permute.xlu1 %211 }
  0xb6   :  { %v230_v38 = vadd.f32 %v212_v37, %v198_v36  ;;  %v210_v40 = vpop.permute.xlu0 %209 }
  0xb7   :  { %v229_v41 = vadd.f32 %v210_v40, %v197_v39  ;;  %v243_v42 = vld [vmem:[#allocation3 + $0x8] sm:$0xff] }
  0xb8   :  { %239 = vst.msk [vmem:[#allocation3 + $0x28] sm:$0xff] %vm233_vm3, %v230_v38  ;;  %v242_v43 = vld [vmem:[#allocation3] sm:$0xff]  ;;  %v251_v44 = vmul.f32 0.11111111, %v243_v42 }
  0xb9   :  { %238 = vst.msk [vmem:[#allocation3 + $0x20] sm:$0xff] %vm233_vm3, %v229_v41  ;;  %v216_v46 = vpop.permute.xlu1 %215  ;;  %v250_v47 = vmul.f32 0.11111111, %v242_v43 }
  0xba   :  { %v232_v48 = vadd.f32 %v216_v46, %v200_v45  ;;  %v214_v50 = vpop.permute.xlu0 %213  ;;  %259 = vst.msk [vmem:[#allocation7 + $0x8] sm:$0xff] %vm38_vm0, %v251_v44 }
  0xbb   :  { %v231_v51 = vadd.f32 %v214_v50, %v199_v49  ;;  %v245_v52 = vld [vmem:[#allocation3 + $0x18] sm:$0xff]  ;;  %258 = vst.msk [vmem:[#allocation7] sm:$0xff] %vm38_vm0, %v250_v47 }
  0xbc   :  { %241 = vst.msk [vmem:[#allocation3 + $0x38] sm:$0xff] %vm233_vm3, %v232_v48  ;;  %v244_v53 = vld [vmem:[#allocation3 + $0x10] sm:$0xff]  ;;  %v253_v54 = vmul.f32 0.11111111, %v245_v52 }
  0xbd   :  { %240 = vst.msk [vmem:[#allocation3 + $0x30] sm:$0xff] %vm233_vm3, %v231_v51  ;;  %v252_v55 = vmul.f32 0.11111111, %v244_v53 }
  0xbe   :  { %261 = vst.msk [vmem:[#allocation7 + $0x18] sm:$0xff] %vm38_vm0, %v253_v54 }
  0xbf   :  { %v247_v56 = vld [vmem:[#allocation3 + $0x28] sm:$0xff]  ;;  %260 = vst.msk [vmem:[#allocation7 + $0x10] sm:$0xff] %vm38_vm0, %v252_v55 }
  0xc0   :  { %v246_v57 = vld [vmem:[#allocation3 + $0x20] sm:$0xff]  ;;  %v255_v58 = vmul.f32 0.11111111, %v247_v56 }
  0xc1   :  { %v254_v59 = vmul.f32 0.11111111, %v246_v57 }
  0xc2   :  { %263 = vst.msk [vmem:[#allocation7 + $0x28] sm:$0xff] %vm38_vm0, %v255_v58 }
  0xc3   :  { %v249_v60 = vld [vmem:[#allocation3 + $0x38] sm:$0xff]  ;;  %262 = vst.msk [vmem:[#allocation7 + $0x20] sm:$0xff] %vm38_vm0, %v254_v59 }
  0xc4   :  { %v248_v61 = vld [vmem:[#allocation3 + $0x30] sm:$0xff]  ;;  %v257_v62 = vmul.f32 0.11111111, %v249_v60 }
  0xc5   :  { %v256_v63 = vmul.f32 0.11111111, %v248_v61 }
  0xc6   :  { %265 = vst.msk [vmem:[#allocation7 + $0x38] sm:$0xff] %vm38_vm0, %v257_v62 }
  0xc7   :  { %264 = vst.msk [vmem:[#allocation7 + $0x30] sm:$0xff] %vm38_vm0, %v256_v63 }
  0xc8   :  { %320 = shalt.err (!%p317_p9)
}
  0xc9   :  { %277 = dma.vmem_to_hbm [thread:$0]  %s272_s15, 1024, %s418_s1, [#allocation6], %s334_s9, %s334_s9, %s335_s10  }
  0xca   :  { %331 = dma.done.wait [#allocation6], 1024  }
  0xcb   :  { %332 = vsyncadd [#allocation6], 4294966272 }
  0xcc   :  { %281 = vsyncpa [#allocation5], 1 }
  0xcd   :  { %282 = vsyncpa [#allocation6], 1 }

</bundles_post_ra>
